<compile_context>
chip_gen: v7x
topology: tpu7x:2x2x1
jax: 0.10.0
libtpu: 0.0.40
codegen_flags: <defaults>
</compile_context>

<pallas_src>
import functools

import jax
import jax.numpy as jnp
from jax.experimental import pallas as pl
from jax.experimental.pallas import tpu as pltpu

LANE = 128            # TPU lane width: feature dims are padded to this
SUBLANE = 16          # bf16 sublane pack: batch tiles are multiples of this
MAX_BATCH_TILE = 512  # rows per grid step (keeps the MXU fed, fits VMEM)


def _round_up(n, m):
    return ((n + m - 1) // m) * m


def _pad_axis(a, target, axis):
    pad = target - a.shape[axis]
    if pad <= 0:
        return a
    cfg = [(0, 0)] * a.ndim
    cfg[axis] = (0, pad)
    return jnp.pad(a, cfg)


def _pad2(a, rows, cols):
    return _pad_axis(_pad_axis(a, rows, 0), cols, 1)


# ---------------------------------------------------------------------------
# Static / trace-time hardware probes (all cached, called outside jit first).
# ---------------------------------------------------------------------------

@functools.lru_cache(maxsize=None)
def _vmem_capacity_bytes():
    try:
        return int(pltpu.get_tpu_info().vmem_capacity_bytes)
    except Exception:
        return 64 * 1024 * 1024  # conservative default: v7x per-TC VMEM


@functools.lru_cache(maxsize=None)
def _epilogue_dtype():
    """bf16 bias+ReLU epilogue on chips with native bf16 VPU ALUs (v6e/v7x);
    keep f32 on v5e and older where bf16 elementwise would be emulated."""
    try:
        kind = jax.devices()[0].device_kind.lower()
    except Exception:
        return jnp.float32
    if any(g in kind for g in ("v2", "v3", "v4", "v5")):
        return jnp.float32
    return jnp.bfloat16


@functools.lru_cache(maxsize=None)
def _single_buffer_supported():
    """Probe (once) whether pipeline_mode=pl.Buffered(1) compiles and runs.
    Single-buffering the grid-invariant weight blocks halves their VMEM
    footprint; if unsupported we fall back to default double-buffering."""
    def _probe_kernel(w_ref, x_ref, o_ref):
        o_ref[...] = x_ref[...] + w_ref[...]

    try:
        fn = pl.pallas_call(
            _probe_kernel,
            out_shape=jax.ShapeDtypeStruct((16, 128), jnp.float32),
            grid=(2,),
            in_specs=[
                pl.BlockSpec((8, 128), lambda i: (0, 0),
                             pipeline_mode=pl.Buffered(1)),
                pl.BlockSpec((8, 128), lambda i: (i, 0)),
            ],
            out_specs=pl.BlockSpec((8, 128), lambda i: (i, 0)),
        )
        w = jnp.zeros((8, 128), jnp.float32)
        x = jnp.zeros((16, 128), jnp.float32)
        jax.block_until_ready(fn(w, x))
        return True
    except Exception:
        return False


def _resident_spec(shape):
    """Weights/biases map to block (0, 0) on every grid step (VMEM-resident);
    single-buffer them when supported so default double-buffering doesn't
    double the weight footprint."""
    if _single_buffer_supported():
        return pl.BlockSpec(shape, lambda i: (0, 0),
                            pipeline_mode=pl.Buffered(1))
    return pl.BlockSpec(shape, lambda i: (0, 0))


def _weight_buffer_count():
    return 1 if _single_buffer_supported() else 2


def _choose_batch_tile(B):
    """Balanced batch tiles: minimal padding, sublane-aligned, and >=2 grid
    steps whenever the batch is big enough to usefully feed both of v7x's
    TensorCores (harmless on single-TC v5e/v6e)."""
    num_tiles = -(-B // MAX_BATCH_TILE)       # ceil
    if num_tiles < 2 and B > 256:
        num_tiles = 2
    tb = max(SUBLANE, _round_up(-(-B // num_tiles), SUBLANE))
    b_p = _round_up(B, tb)
    return tb, b_p


def _choose_feature_tile(dim_p, cap=512):
    for t in (cap, 256, 128):
        if dim_p % t == 0:
            return min(t, dim_p)
    return min(128, dim_p)


# ---------------------------------------------------------------------------
# Kernels
# ---------------------------------------------------------------------------

def _mlp_fused_kernel(x_ref, w1_ref, b1_ref, w2_ref, b2_ref, w3_ref, b3_ref,
                      o_ref):
    # Layer 1: cast x in-kernel (VPU work hidden under MXU), f32 accumulate,
    # bias+ReLU epilogue in the bias dtype (bf16 on v6e/v7x, f32 on v5e).
    x = x_ref[...].astype(w1_ref.dtype)
    h = jnp.dot(x, w1_ref[...], preferred_element_type=jnp.float32)
    h = jnp.maximum(h.astype(b1_ref.dtype) + b1_ref[...], 0.0)
    # Layer 2.
    h = jnp.dot(h.astype(w2_ref.dtype), w2_ref[...],
                preferred_element_type=jnp.float32)
    h = jnp.maximum(h.astype(b2_ref.dtype) + b2_ref[...], 0.0)
    # Output layer: f32 bias add, single cast to the output dtype.
    out = jnp.dot(h.astype(w3_ref.dtype), w3_ref[...],
                  preferred_element_type=jnp.float32)
    o_ref[...] = (out + b3_ref[...]).astype(o_ref.dtype)


def _linear_kernel(x_ref, w_ref, b_ref, o_ref, acc_ref, *, relu):
    """One Linear (+ optional ReLU) with K tiled as the last grid axis."""
    @pl.when(pl.program_id(2) == 0)
    def _():
        acc_ref[...] = jnp.zeros_like(acc_ref)

    acc_ref[...] += jnp.dot(x_ref[...].astype(w_ref.dtype), w_ref[...],
                            preferred_element_type=jnp.float32)

    @pl.when(pl.program_id(2) == pl.num_programs(2) - 1)
    def _():
        y = acc_ref[...] + b_ref[...]
        if relu:
            y = jnp.maximum(y, 0.0)
        o_ref[...] = y.astype(o_ref.dtype)


def _tiled_linear(x, w, b, *, relu, out_dtype, tm):
    """Fallback path: y = relu?(x @ w + b), feature dims tiled so weights do
    not need to be fully VMEM-resident (wide MLPs / v7x 64 MiB VMEM)."""
    M, K = x.shape
    _, N = w.shape
    tn = _choose_feature_tile(N)
    tk = _choose_feature_tile(K)
    grid = (M // tm, N // tn, K // tk)

    return pl.pallas_call(
        functools.partial(_linear_kernel, relu=relu),
        out_shape=jax.ShapeDtypeStruct((M, N), out_dtype),
        grid=grid,
        in_specs=[
            pl.BlockSpec((tm, tk), lambda i, j, k: (i, k)),
            pl.BlockSpec((tk, tn), lambda i, j, k: (k, j)),
            pl.BlockSpec((1, tn), lambda i, j, k: (0, j)),
        ],
        out_specs=pl.BlockSpec((tm, tn), lambda i, j, k: (i, j)),
        scratch_shapes=[pltpu.VMEM((tm, tn), jnp.float32)],
        compiler_params=pltpu.CompilerParams(
            dimension_semantics=("parallel", "parallel", "arbitrary")),
    )(x, w, b)


# ---------------------------------------------------------------------------
# Forward pass
# ---------------------------------------------------------------------------

def prepare_params(params, compute_dtype=jnp.bfloat16):
    """One-time lane-alignment (pad feature dims to 128) + cast of weights to
    the MXU compute dtype.  Call at init / checkpoint-load time so the
    per-step forward pays no extra HBM pass over the weights."""
    w1, b1, w2, b2, w3, b3 = (params["w1"], params["b1"], params["w2"],
                              params["b2"], params["w3"], params["b3"])
    d_in, h1 = w1.shape
    _, h2 = w2.shape
    _, d_out = w3.shape
    d_in_p, h1_p = _round_up(d_in, LANE), _round_up(h1, LANE)
    h2_p, d_out_p = _round_up(h2, LANE), _round_up(d_out, LANE)

    ep = _epilogue_dtype()
    return {
        "w1": _pad2(w1, d_in_p, h1_p).astype(compute_dtype),
        "w2": _pad2(w2, h1_p, h2_p).astype(compute_dtype),
        "w3": _pad2(w3, h2_p, d_out_p).astype(compute_dtype),
        "b1": _pad_axis(b1, h1_p, 1).astype(ep),
        "b2": _pad_axis(b2, h2_p, 1).astype(ep),
        "b3": _pad_axis(b3, d_out_p, 1).astype(jnp.float32),
    }


def _mlp_forward_padded(x, p, d_out, force_tiled=False):
    B, d_in = x.shape
    out_dtype = x.dtype
    d_in_p, h1_p = p["w1"].shape
    _, h2_p = p["w2"].shape
    _, d_out_p = p["w3"].shape

    TB, B_p = _choose_batch_tile(B)
    grid = (B_p // TB,)

    # Stream x in its ORIGINAL dtype (cast to bf16 in-kernel); only materialize
    # a padded copy when the shapes actually require it.
    x_in = x
    if d_in_p != d_in:
        x_in = _pad_axis(x_in, d_in_p, 1)
    if B_p != B:
        x_in = _pad_axis(x_in, B_p, 0)

    # VMEM footprint of the fused resident-weight strategy.
    w_itemsize = p["w1"].dtype.itemsize
    w_elems = d_in_p * h1_p + h1_p * h2_p + h2_p * d_out_p
    nbuf = _weight_buffer_count()
    weight_bytes = nbuf * w_itemsize * w_elems
    bias_bytes = nbuf * 4 * (h1_p + h2_p + d_out_p)
    tile_bytes = 2 * TB * (d_in_p * x.dtype.itemsize + d_out_p * out_dtype.itemsize)
    interm_bytes = 4 * TB * (h1_p + h2_p)          # worst-case f32 intermediates
    footprint = weight_bytes + bias_bytes + tile_bytes + interm_bytes

    vmem_budget = int(_vmem_capacity_bytes() * 0.75)

    if footprint <= vmem_budget and not force_tiled:
        vmem_limit = int(min(vmem_budget, max(32 * 1024 * 1024, 2 * footprint)))
        flops = 2 * B_p * w_elems
        bytes_accessed = int(
            B_p * d_in_p * x.dtype.itemsize           # streamed x (original dtype)
            + w_itemsize * w_elems                    # resident weights
            + 4 * (h1_p + h2_p + d_out_p)             # biases
            + B_p * d_out_p * out_dtype.itemsize)     # output

        out_p = pl.pallas_call(
            _mlp_fused_kernel,
            out_shape=jax.ShapeDtypeStruct((B_p, d_out_p), out_dtype),
            grid=grid,
            in_specs=[
                pl.BlockSpec((TB, d_in_p), lambda i: (i, 0)),   # stream batch tiles
                _resident_spec((d_in_p, h1_p)), _resident_spec((1, h1_p)),
                _resident_spec((h1_p, h2_p)), _resident_spec((1, h2_p)),
                _resident_spec((h2_p, d_out_p)), _resident_spec((1, d_out_p)),
            ],
            out_specs=pl.BlockSpec((TB, d_out_p), lambda i: (i, 0)),
            compiler_params=pltpu.CompilerParams(
                dimension_semantics=("parallel",),    # 2 TCs on v7x
                vmem_limit_bytes=vmem_limit,
            ),
            cost_estimate=pl.CostEstimate(
                flops=flops, transcendentals=0, bytes_accessed=bytes_accessed),
        )(x_in, p["w1"], p["b1"], p["w2"], p["b2"], p["w3"], p["b3"])
    else:
        # Weights too large to keep fully resident: per-layer K/N-tiled matmuls.
        h = _tiled_linear(x_in, p["w1"], p["b1"], relu=True,
                          out_dtype=p["w1"].dtype, tm=TB)
        h = _tiled_linear(h, p["w2"], p["b2"], relu=True,
                          out_dtype=p["w2"].dtype, tm=TB)
        out_p = _tiled_linear(h, p["w3"], p["b3"], relu=False,
                              out_dtype=out_dtype, tm=TB)

    return out_p[:B, :d_out]


def make_mlp_forward(params, compute_dtype=jnp.bfloat16):
    """Pad + cast the params ONCE and return a jitted forward(x) callable."""
    # Warm static hardware probes outside of jit tracing.
    _vmem_capacity_bytes()
    _single_buffer_supported()
    prepared = prepare_params(params, compute_dtype)
    d_out = params["w3"].shape[1]

    @jax.jit
    def _forward(x, p):
        return _mlp_forward_padded(x, p, d_out)

    return lambda x: _forward(x, prepared)


# ---------------------------------------------------------------------------
# Init / reference / test
# ---------------------------------------------------------------------------

def init_mlp_params(key, input_dim, output_dim, hidden_dims=(64, 64)):
    """Deterministic init mirroring nn.Linear default U(-1/sqrt(fan_in), +).
    Weights stored as [in_features, out_features] (transposed vs. PyTorch)."""
    assert len(hidden_dims) == 2, "fused kernel assumes two hidden layers"
    dims = [input_dim] + list(hidden_dims) + [output_dim]
    params = {}
    for i in range(len(dims) - 1):
        fan_in, fan_out = dims[i], dims[i + 1]
        key, kw, kb = jax.random.split(key, 3)
        bound = 1.0 / (fan_in ** 0.5)
        params[f"w{i + 1}"] = jax.random.uniform(
            kw, (fan_in, fan_out), jnp.float32, minval=-bound, maxval=bound)
        params[f"b{i + 1}"] = jax.random.uniform(
            kb, (1, fan_out), jnp.float32, minval=-bound, maxval=bound)
    return params


def mlp_reference(x, params):
    """Plain-JAX f32 reference of the same forward pass."""
    h = jnp.maximum(x @ params["w1"] + params["b1"], 0.0)
    h = jnp.maximum(h @ params["w2"] + params["b2"], 0.0)
    return h @ params["w3"] + params["b3"]


if __name__ == "__main__":
    key = jax.random.PRNGKey(0)
    k_x, k_p = jax.random.split(key)

    batch, input_dim, output_dim = 2, 32, 8
    x = jax.random.normal(k_x, (batch, input_dim), jnp.float32)
    params = init_mlp_params(k_p, input_dim, output_dim, hidden_dims=(64, 64))

    # Fused resident-weight path (weights padded / bf16-cast exactly once).
    forward = make_mlp_forward(params)
    out = jax.block_until_ready(forward(x))

    ref = mlp_reference(x, params)
    assert out.shape == (batch, output_dim), out.shape
    # bf16 matmul operands (f32 accumulate) -> loosened tolerance vs f32 ref.
    assert jnp.allclose(out, ref, atol=2e-2, rtol=2e-2), "fused path mismatch"

    # Also exercise the feature-tiled fallback (used automatically when the
    # weight footprint exceeds the per-generation VMEM budget, e.g. on v7x).
    prepared = prepare_params(params)

    @jax.jit
    def forward_tiled(xx, pp):
        return _mlp_forward_padded(xx, pp, output_dim, force_tiled=True)

    out_tiled = jax.block_until_ready(forward_tiled(x, prepared))
    assert out_tiled.shape == (batch, output_dim), out_tiled.shape
    assert jnp.allclose(out_tiled, ref, atol=2e-2, rtol=2e-2), "tiled path mismatch"

    print("KERNEL_OK")
</pallas_src>

<mosaic_0001>
module attributes {stable_mosaic.version = 11 : i64} {
  func.func @_probe_kernel(%arg0: i32, %arg1: memref<8x128xf32, #tpu.memory_space<vmem>>, %arg2: memref<8x128xf32, #tpu.memory_space<vmem>>, %arg3: memref<8x128xf32, #tpu.memory_space<vmem>>) attributes {dimension_semantics = [#tpu.dimension_semantics<arbitrary>], iteration_bounds = array<i64: 2>, scalar_prefetch = 0 : i64, scratch_operands = 0 : i64, tpu.core_type = #tpu.core_type<tc>, window_params = [{pipeline_mode = #tpu.pipeline_mode<synchronous>, transform_indices = @transform_0, window_bounds = array<i64: 8, 128>}, {transform_indices = @transform_1, window_bounds = array<i64: 8, 128>}, {transform_indices = @transform_2, window_bounds = array<i64: 8, 128>}]} {
    %c0 = arith.constant 0 : index
    %c0_0 = arith.constant 0 : index
    %0 = vector.load %arg2[%c0, %c0_0] : memref<8x128xf32, #tpu.memory_space<vmem>>, vector<8x128xf32>
    %c0_1 = arith.constant 0 : index
    %c0_2 = arith.constant 0 : index
    %1 = vector.load %arg1[%c0_1, %c0_2] : memref<8x128xf32, #tpu.memory_space<vmem>>, vector<8x128xf32>
    %2 = arith.addf %0, %1 : vector<8x128xf32>
    %c0_3 = arith.constant 0 : index
    %c0_4 = arith.constant 0 : index
    %3 = vector.load %arg3[%c0_3, %c0_4] : memref<8x128xf32, #tpu.memory_space<vmem>>, vector<8x128xf32>
    tpu.vector_store %arg3[%c0_3, %c0_4], %2 {strides = array<i32>} : memref<8x128xf32, #tpu.memory_space<vmem>>, vector<8x128xf32>,
    return
  }
  func.func @transform_0(%arg0: i32) -> (i32, i32) {
    %c0_i32 = arith.constant 0 : i32
    %c0_i32_0 = arith.constant 0 : i32
    %c0_i32_1 = arith.constant 0 : i32
    return %c0_i32, %c0_i32_0 : i32, i32
  }
  func.func @transform_1(%arg0: i32) -> (i32, i32) {
    %c0_i32 = arith.constant 0 : i32
    %c0_i32_0 = arith.constant 0 : i32
    return %arg0, %c0_i32 : i32, i32
  }
  func.func @transform_2(%arg0: i32) -> (i32, i32) {
    %c0_i32 = arith.constant 0 : i32
    %c0_i32_0 = arith.constant 0 : i32
    return %arg0, %c0_i32 : i32, i32
  }
}

module attributes {stable_mosaic.version = 11 : i64} {
  func.func @_mlp_fused_kernel(%arg0: i32, %arg1: memref<16x128xf32, #tpu.memory_space<vmem>>, %arg2: memref<128x128xbf16, #tpu.memory_space<vmem>>, %arg3: memref<1x128xbf16, #tpu.memory_space<vmem>>, %arg4: memref<128x128xbf16, #tpu.memory_space<vmem>>, %arg5: memref<1x128xbf16, #tpu.memory_space<vmem>>, %arg6: memref<128x128xbf16, #tpu.memory_space<vmem>>, %arg7: memref<1x128xf32, #tpu.memory_space<vmem>>, %arg8: memref<16x128xf32, #tpu.memory_space<vmem>>) attributes {dimension_semantics = [#tpu.dimension_semantics<parallel>], iteration_bounds = array<i64: 1>, scalar_prefetch = 0 : i64, scratch_operands = 0 : i64, tpu.core_type = #tpu.core_type<tc>, window_params = [{transform_indices = @transform_0, window_bounds = array<i64: 16, 128>}, {pipeline_mode = #tpu.pipeline_mode<synchronous>, transform_indices = @transform_1, window_bounds = array<i64: 128, 128>}, {pipeline_mode = #tpu.pipeline_mode<synchronous>, transform_indices = @transform_2, window_bounds = array<i64: 1, 128>}, {pipeline_mode = #tpu.pipeline_mode<synchronous>, transform_indices = @transform_3, window_bounds = array<i64: 128, 128>}, {pipeline_mode = #tpu.pipeline_mode<synchronous>, transform_indices = @transform_4, window_bounds = array<i64: 1, 128>}, {pipeline_mode = #tpu.pipeline_mode<synchronous>, transform_indices = @transform_5, window_bounds = array<i64: 128, 128>}, {pipeline_mode = #tpu.pipeline_mode<synchronous>, transform_indices = @transform_6, window_bounds = array<i64: 1, 128>}, {transform_indices = @transform_7, window_bounds = array<i64: 16, 128>}]} {
    %c0 = arith.constant 0 : index
    %c0_0 = arith.constant 0 : index
    %0 = vector.load %arg1[%c0, %c0_0] : memref<16x128xf32, #tpu.memory_space<vmem>>, vector<16x128xf32>
    %1 = arith.truncf %0 : vector<16x128xf32> to vector<16x128xbf16>
    %c0_1 = arith.constant 0 : index
    %c0_2 = arith.constant 0 : index
    %2 = vector.load %arg2[%c0_1, %c0_2] : memref<128x128xbf16, #tpu.memory_space<vmem>>, vector<128x128xbf16>
    %cst = arith.constant dense<0.000000e+00> : vector<16x128xf32>
    %3 = tpu.matmul %1, %2, %cst {dimension_numbers = #tpu.dot_dimension_numbers<[1], [0], [0], [1], [0, 0, 1, 1], [], []>} : vector<16x128xbf16>, vector<128x128xbf16>, vector<16x128xf32> -> vector<16x128xf32>
    %4 = arith.truncf %3 : vector<16x128xf32> to vector<16x128xbf16>
    %c0_3 = arith.constant 0 : index
    %c0_4 = arith.constant 0 : index
    %5 = vector.load %arg3[%c0_3, %c0_4] : memref<1x128xbf16, #tpu.memory_space<vmem>>, vector<1x128xbf16>
    %6 = vector.broadcast %5 : vector<1x128xbf16> to vector<16x128xbf16>
    %7 = arith.addf %4, %6 : vector<16x128xbf16>
    %cst_5 = arith.constant 0.000000e+00 : bf16
    %8 = vector.broadcast %cst_5 : bf16 to vector<16x128xbf16>
    %9 = arith.maximumf %7, %8 : vector<16x128xbf16>
    %c0_6 = arith.constant 0 : index
    %c0_7 = arith.constant 0 : index
    %10 = vector.load %arg4[%c0_6, %c0_7] : memref<128x128xbf16, #tpu.memory_space<vmem>>, vector<128x128xbf16>
    %cst_8 = arith.constant dense<0.000000e+00> : vector<16x128xf32>
    %11 = tpu.matmul %9, %10, %cst_8 {dimension_numbers = #tpu.dot_dimension_numbers<[1], [0], [0], [1], [0, 0, 1, 1], [], []>} : vector<16x128xbf16>, vector<128x128xbf16>, vector<16x128xf32> -> vector<16x128xf32>
    %12 = arith.truncf %11 : vector<16x128xf32> to vector<16x128xbf16>
    %c0_9 = arith.constant 0 : index
    %c0_10 = arith.constant 0 : index
    %13 = vector.load %arg5[%c0_9, %c0_10] : memref<1x128xbf16, #tpu.memory_space<vmem>>, vector<1x128xbf16>
    %14 = vector.broadcast %13 : vector<1x128xbf16> to vector<16x128xbf16>
    %15 = arith.addf %12, %14 : vector<16x128xbf16>
    %cst_11 = arith.constant 0.000000e+00 : bf16
    %16 = vector.broadcast %cst_11 : bf16 to vector<16x128xbf16>
    %17 = arith.maximumf %15, %16 : vector<16x128xbf16>
    %c0_12 = arith.constant 0 : index
    %c0_13 = arith.constant 0 : index
    %18 = vector.load %arg6[%c0_12, %c0_13] : memref<128x128xbf16, #tpu.memory_space<vmem>>, vector<128x128xbf16>
    %cst_14 = arith.constant dense<0.000000e+00> : vector<16x128xf32>
    %19 = tpu.matmul %17, %18, %cst_14 {dimension_numbers = #tpu.dot_dimension_numbers<[1], [0], [0], [1], [0, 0, 1, 1], [], []>} : vector<16x128xbf16>, vector<128x128xbf16>, vector<16x128xf32> -> vector<16x128xf32>
    %c0_15 = arith.constant 0 : index
    %c0_16 = arith.constant 0 : index
    %20 = vector.load %arg7[%c0_15, %c0_16] : memref<1x128xf32, #tpu.memory_space<vmem>>, vector<1x128xf32>
    %21 = vector.broadcast %20 : vector<1x128xf32> to vector<16x128xf32>
    %22 = arith.addf %19, %21 : vector<16x128xf32>
    %c0_17 = arith.constant 0 : index
    %c0_18 = arith.constant 0 : index
    %23 = vector.load %arg8[%c0_17, %c0_18] : memref<16x128xf32, #tpu.memory_space<vmem>>, vector<16x128xf32>
    tpu.vector_store %arg8[%c0_17, %c0_18], %22 {strides = array<i32>} : memref<16x128xf32, #tpu.memory_space<vmem>>, vector<16x128xf32>,
    return
  }
  func.func @transform_0(%arg0: i32) -> (i32, i32) {
    %c0_i32 = arith.constant 0 : i32
    %c0_i32_0 = arith.constant 0 : i32
    return %arg0, %c0_i32 : i32, i32
  }
  func.func @transform_1(%arg0: i32) -> (i32, i32) {
    %c0_i32 = arith.constant 0 : i32
    %c0_i32_0 = arith.constant 0 : i32
    %c0_i32_1 = arith.constant 0 : i32
    return %c0_i32, %c0_i32_0 : i32, i32
  }
  func.func @transform_2(%arg0: i32) -> (i32, i32) {
    %c0_i32 = arith.constant 0 : i32
    %c0_i32_0 = arith.constant 0 : i32
    %c0_i32_1 = arith.constant 0 : i32
    return %c0_i32, %c0_i32_0 : i32, i32
  }
  func.func @transform_3(%arg0: i32) -> (i32, i32) {
    %c0_i32 = arith.constant 0 : i32
    %c0_i32_0 = arith.constant 0 : i32
    %c0_i32_1 = arith.constant 0 : i32
    return %c0_i32, %c0_i32_0 : i32, i32
  }
  func.func @transform_4(%arg0: i32) -> (i32, i32) {
    %c0_i32 = arith.constant 0 : i32
    %c0_i32_0 = arith.constant 0 : i32
    %c0_i32_1 = arith.constant 0 : i32
    return %c0_i32, %c0_i32_0 : i32, i32
  }
  func.func @transform_5(%arg0: i32) -> (i32, i32) {
    %c0_i32 = arith.constant 0 : i32
    %c0_i32_0 = arith.constant 0 : i32
    %c0_i32_1 = arith.constant 0 : i32
    return %c0_i32, %c0_i32_0 : i32, i32
  }
  func.func @transform_6(%arg0: i32) -> (i32, i32) {
    %c0_i32 = arith.constant 0 : i32
    %c0_i32_0 = arith.constant 0 : i32
    %c0_i32_1 = arith.constant 0 : i32
    return %c0_i32, %c0_i32_0 : i32, i32
  }
  func.func @transform_7(%arg0: i32) -> (i32, i32) {
    %c0_i32 = arith.constant 0 : i32
    %c0_i32_0 = arith.constant 0 : i32
    return %arg0, %c0_i32 : i32, i32
  }
}

</mosaic_0001>

<bundles_post_ra>
// kernel: tpu_custom_call.1
= control target key start
LH: loop header
LB: loop body
LE: loop exit
PB: predicated region body
PF: predicated region fallthrough
CT: control target
= control target key end

     0   :  { %7 = vsyncpa [#allocation3], 0  ;;  %s692_s0 = inlined_call_operand.hbm [shape: f32[8,128], index: 0, kind: input, shape index: {}]   ;;  %s693_s1 = inlined_call_operand.hbm [shape: f32[16,128], index: 1, kind: input, shape index: {}]   ;;  %s694_s2 = inlined_call_operand.hbm [shape: f32[16,128], index: 2, kind: output, shape index: {}]  }
   0x1   :  { %8 = vsyncpa [#allocation6], 0 }
   0x2   :  { %10 = vsyncpa [#allocation6 + $0x1], 0 }
   0x3   :  { %11 = vsyncpa [#allocation4], 0 }
   0x4   :  { %13 = vsyncpa [#allocation4 + $0x1], 0  ;;  %s491_s9 = smov 0   ;;  %s493_s10 = smov 0  }
   0x5   :  { %s495_s11 = smov 0   ;;  %s497_s12 = smov 0  }
   0x6 LB: > { %s512_s13 = sadd.s32 4294967295, %s471_s12   ;;  %s272_s14 = sadd.s32 4294967294, %s471_s12   ;;  %s471_s12 = sphi %s497_s12, %s718_s12   ;;  %s467_s11 = sphi %s495_s11, %s717_s11   ;;  %s463_s10 = sphi %s493_s10, %s716_s10   ;;  %s459_s9 = sphi %s491_s9, %s715_s9  }
   0x7   : > { %p60_p0 = scmp.ne.s32.totalorder %s463_s10, %s459_s9  ;;  %p695_p1 = scmp.eq.s32.totalorder %s512_s13, 0 }
   0x8   : > { %p90_p3 = scmp.eq.s32.totalorder %s272_s14, 1  ;;  %p273_p5 = scmp.ge.s32.totalorder %s471_s12, 1 }
   0x9   : > { %p521_p4 = por %p695_p1, %p60_p0  ;;  %p97_p7 = scmp.lt.s32.totalorder %s471_s12, 3 }
   0xa   : > { %p526_p6 = por %p90_p3, %p60_p0  ;;  %s473_s18 = smov [#allocation2]  }
   0xb   : > { %s698_s15 = scalar_select %p521_p4, 1, 0 }
   0xc   : > { %s699_s16 = scalar_select %p526_p6, 1, 0 }
   0xd   : > { %p531_p8 = pnand %p273_p5, %p97_p7  ;;  %s110_s19 = sshll.u32 %s473_s18, 4  ;;  %s111_s19 = int_to_ptr.vmem [resolvable:$true] %s110_s19 }
   0xe   : > { %s539_s20 = sadd.s32 1, %s471_s12   ;;  %s47_s24 = sadd.s32 1, %s467_s11 }
   0xf   : > { %s700_s17 = scalar_select %p531_p8, 1, 0 }
  0x10   : > { %p294_p10 = pneg %p531_p8  ;;  %s44_s22 = ssub.s32 %s471_s12, %s539_s20 }
  0x11   : > { %p549_p12 = scmp.eq.s32.totalorder %s44_s22, 0  ;;  %s343_s27 = scalar_lea.hbm %s692_s0, 128 }
  0x12   : > { %p543_p11 = pnand %p294_p10, %p695_p1  ;;  %p344_p0 = scmp.ne.s32.totalorder %s692_s0, %s343_s27 }
  0x13   : > { %s702_s23 = scalar_select %p549_p12, 1, 0 }
  0x14   : > { %p345_p3 = pneg %p543_p11  ;;  %p350_p10 = scmp.lt.u32.totalorder %s343_s27, %s692_s0 }
  0x16   : > { %p346_p5 = pnand %p345_p3, %p344_p0 }
  0x18   : > { %p347_p7 = pneg %p346_p5 }
  0x1a   : > { %p352_p9 = pnand %p350_p10, %p347_p7 }
  0x1c   : > { %355 = shalt.err (!%p352_p9)
}
  0x1d   : > { %s356_s4 = scalar_lea.vmem %s111_s19, 128  ;;  %p364_p6 = scmp.lt.s32.totalorder %s111_s19, %s111_s19 }
  0x1e   : > { %p357_p1 = scmp.ne.s32.totalorder %s111_s19, %s356_s4  ;;  %p365_p4 = scmp.lt.s32.totalorder %s356_s4, %s356_s4 }
  0x20   : > { %p359_p2 = pnand %p357_p1, %p345_p3  ;;  %p366_p8 = por %p365_p4, %p364_p6 }
  0x22   : > { %p360_p13 = pneg %p359_p2 }
  0x24   : > { %p367_p12 = pnand %p366_p8, %p360_p13 }
  0x26   : > { %370 = shalt.err (!%p367_p12)
}
  0x27   : > { %297 = dma.hbm_to_vmem [thread:$0]  (!%p543_p11), %s692_s0, 128, %s111_s19, [#allocation3]  }
  0x28   : > { %p703_p1 = scmp.ne.s32.totalorder %s702_s23, 0  ;;  %p55_p2 = scmp.eq.s32.totalorder %s471_s12, 0 }
  0x29   : > { %p704_p4 = scmp.ne.s32.totalorder %s467_s11, %s463_s10  ;;  %p705_p6 = scmp.eq.s32.totalorder %s512_s13, 1 }
  0x2a   : > { %s575_s7 = scalar_select %p703_p1, %s467_s11, %s47_s24  }
  0x2b   : > { %p583_p8 = por %p705_p6, %p704_p4  ;;  %p307_p9 = scmp.lt.s32.totalorder %s471_s12, 2 }
  0x2c   : > { %s121_s14 = sand.u32 1, %s467_s11   ;;  %p707_p12 = pmov %p704_p4 }
  0x2d   : > { %s276_s18 = sshll.u32 %s121_s14, 3  ;;  %s277_s21 = sshll.u32 %s471_s12, 7 }
  0x2e   : > { %p56_p13 = por %p55_p2, %p707_p12  ;;  %s596_s19 = scalar_lea.hbm %s693_s1, %s277_s21 }
  0x2f   : > { %s125_s23 = scalar_lea.vmem [#allocation5], %s276_s18  ;;  %s122_s27 = scalar_lea.sflag [#allocation6], %s121_s14 }
  0x30   : > { %s132_s24 = sshll.u32 %s125_s23, 4  ;;  %p598_p11 = pnand %p307_p9, %p56_p13  ;;  %s602_s24 = int_to_ptr.vmem [resolvable:$true] %s132_s24 }
  0x31   : > { %s371_s28 = scalar_lea.hbm %s596_s19, 128  ;;  %s376_s3 = scalar_lea.hbm %s693_s1, 256 }
  0x32   : > { %p372_p0 = scmp.ne.s32.totalorder %s596_s19, %s371_s28  ;;  %p373_p3 = pneg %p598_p11 }
  0x33   : > { %p377_p10 = scmp.lt.u32.totalorder %s596_s19, %s693_s1  ;;  %p378_p1 = scmp.lt.u32.totalorder %s376_s3, %s371_s28 }
  0x34   : > { %p374_p5 = pnand %p373_p3, %p372_p0  ;;  %p380_p4 = scmp.lt.u32.totalorder %s371_s28, %s596_s19 }
  0x35   : > { %p379_p2 = por %p378_p1, %p377_p10 }
  0x36   : > { %p375_p7 = pneg %p374_p5 }
  0x37   : > { %p381_p6 = por %p380_p4, %p379_p2 }
  0x39   : > { %p382_p9 = pnand %p381_p6, %p375_p7 }
  0x3b   : > { %385 = shalt.err (!%p382_p9)
}
  0x3c   : > { %s386_s6 = scalar_lea.vmem %s602_s24, 128  ;;  %s474_s14 = smov [#allocation5]  }
  0x3d   : > { %p387_p12 = scmp.ne.s32.totalorder %s602_s24, %s386_s6  ;;  %s391_s18 = sshll.u32 %s474_s14, 4  ;;  %s392_s18 = int_to_ptr.vmem [resolvable:$false] %s391_s18 }
  0x3e   : > { %s393_s21 = scalar_lea.vmem %s392_s18, 256  ;;  %p394_p5 = scmp.lt.s32.totalorder %s602_s24, %s392_s18 }
  0x3f   : > { %p389_p13 = pnand %p387_p12, %p373_p3  ;;  %p395_p10 = scmp.lt.s32.totalorder %s393_s21, %s386_s6 }
  0x41   : > { %p390_p0 = pneg %p389_p13  ;;  %p396_p1 = por %p395_p10, %p394_p5 }
  0x43   : > { %p397_p2 = pnand %p396_p1, %p390_p0 }
  0x45   : > { %400 = shalt.err (!%p397_p2)
}
  0x46   : > { %301 = dma.hbm_to_vmem [thread:$0]  (!%p598_p11), %s596_s19, 128, %s602_s24, %s122_s27  }
  0x47   : > { %p709_p7 = scmp.ne.s32.totalorder %s700_s17, 0 }
  0x48   : > { %p710_p3 = scmp.eq.s32.totalorder (!%p709_p7), %s512_s13, 0 }
  0x49   : > { %141 = sbr.rel (%p709_p7) target bundleno = 110 (0x6e), region = 28 }
  0x50   : > { %446 = dma.done.wait (%p710_p3), [#allocation3], 128   ;;  %p711_p4 = pmov %p710_p3 }
  0x51   : > { %s636_s22 = sand.u32 1, %s463_s10   ;;  %p712_p6 = scmp.ne.s32.totalorder %s698_s15, 0 }
  0x52   : > { %448 = vsyncadd (%p711_p4), [#allocation3], 4294967168  ;;  %s280_s25 = sshll.u32 %s636_s22, 3  ;;  %s148_s23 = scalar_lea.sflag [#allocation6], %s636_s22 }
  0x53   : > { %s151_s26 = scalar_lea.vmem [#allocation5], %s280_s25 }
  0x54   : > { %450 = dma.done.wait (%p712_p6), %s148_s23, 128  }
  0x55   : > { %452 = vsyncadd (%p712_p6), %s148_s23, 4294967168  ;;  %s171_s17 = scalar_lea.vmem [#allocation7], %s280_s25  ;;  %s283_s24 = sshll.u32 %s512_s13, 7  ;;  %v172_v0 = vld [vmem:[%s151_s26] sm:$0xff]  ;;  %v173_v1 = vld [vmem:[#allocation2] sm:$0xff] }
  0x56   : > { %s190_s19 = sshll.u32 %s171_s17, 4  ;;  %v174_v2 = vadd.f32 %v173_v1, %v172_v0  ;;  %s650_s29 = scalar_lea.hbm %s694_s2, %s283_s24  ;;  %s645_s19 = int_to_ptr.vmem [resolvable:$true] %s190_s19 }
  0x57   : > { %s177_s15 = scalar_lea.sflag [#allocation4], %s636_s22  ;;  %s401_s30 = scalar_lea.vmem %s645_s19, 128 }
  0x58   : > { %175 = vst [vmem:[%s171_s17] sm:$0xff] %v174_v2  ;;  %p402_p11 = scmp.ne.s32.totalorder %s645_s19, %s401_s30  ;;  %s475_s13 = smov [#allocation7]  }
  0x59   : > { %s405_s3 = sshll.u32 %s475_s13, 4  ;;  %s406_s3 = int_to_ptr.vmem [resolvable:$false] %s405_s3 }
  0x5a   : > { %p403_p9 = pnand %p402_p11, %p583_p8  ;;  %s407_s4 = scalar_lea.vmem %s406_s3, 256 }
  0x5b   : > { %p408_p13 = scmp.lt.s32.totalorder %s645_s19, %s406_s3  ;;  %p409_p0 = scmp.lt.s32.totalorder %s407_s4, %s401_s30 }
  0x5c   : > { %p404_p12 = pneg %p403_p9 }
  0x5d   : > { %p410_p5 = por %p409_p0, %p408_p13 }
  0x5f   : > { %p411_p10 = pnand %p410_p5, %p404_p12 }
  0x61   : > { %414 = shalt.err (!%p411_p10)
}
  0x62   : > { %s415_s5 = scalar_lea.hbm %s650_s29, 128  ;;  %s419_s18 = scalar_lea.hbm %s694_s2, 256 }
  0x63   : > { %p416_p1 = scmp.ne.s32.totalorder %s650_s29, %s415_s5  ;;  %p420_p3 = scmp.lt.u32.totalorder %s650_s29, %s694_s2 }
  0x64   : > { %p421_p4 = scmp.lt.u32.totalorder %s419_s18, %s415_s5  ;;  %p423_p11 = scmp.lt.u32.totalorder %s415_s5, %s650_s29 }
  0x65   : > { %p417_p2 = pnand %p416_p1, %p583_p8 }
  0x66   : > { %p422_p6 = por %p421_p4, %p420_p3 }
  0x67   : > { %p418_p7 = pneg %p417_p2 }
  0x68   : > { %p424_p9 = por %p423_p11, %p422_p6 }
  0x6a   : > { %p425_p12 = pnand %p424_p9, %p418_p7 }
  0x6c   : > { %428 = shalt.err (!%p425_p12)
}
  0x6d   : > { %292 = dma.vmem_to_hbm [thread:$0]  (%p583_p8), %s645_s19, 128, %s650_s29, %s177_s15  }
  0x6e PF: > { %s202_s25 = sand.u32 1, %s459_s9   ;;  %p713_p13 = scmp.ne.s32.totalorder %s699_s16, 0 }
  0x6f   : > { %p714_p0 = scmp.ge.s32.totalorder %s471_s12, 2  ;;  %s203_s23 = scalar_lea.sflag [#allocation4], %s202_s25 }
  0x71   : > { %p303_p5 = pnand %p714_p0, %p713_p13 }
  0x73   : > { %454 = dma.done.wait (!%p303_p5), %s203_s23, 128  }
  0x74   : > { %456 = vsyncadd (!%p303_p5), %s203_s23, 4294967168  ;;  %p16_p10 = scmp.ge.s32.totalorder %s539_s20, 4   ;;  %s715_s9 = smov %s463_s10 }
  0x75   : > { %s716_s10 = smov %s467_s11  ;;  %s717_s11 = smov %s575_s7 }
  0x76   : > { %s718_s12 = smov %s539_s20  ;;  %18 = sbr.rel (!%p16_p10) target bundleno = 6 (0x6), region = 78 }
  0x7d   :  { %208 = vsyncpa [#allocation3], 1 }
  0x7e   :  { %210 = vsyncpa [#allocation3 + $0x1], 1 }
  0x7f   :  { %211 = vsyncpa [#allocation6], 1 }
  0x80   :  { %213 = vsyncpa [#allocation6 + $0x1], 1 }
  0x81   :  { %214 = vsyncpa [#allocation4], 1 }
  0x82   :  { %216 = vsyncpa [#allocation4 + $0x1], 1 }

// kernel: _forward.1
= control target key start
LH: loop header
LB: loop body
LE: loop exit
PB: predicated region body
PF: predicated region fallthrough
CT: control target
= control target key end

     0   :  { %12 = vsyncpa [#allocation3], 0  ;;  %s788_s0 = inlined_call_operand.vmem [shape: f32[16,128], index: 0, kind: input, shape index: {}]   ;;  %s789_s1 = inlined_call_operand.hbm [shape: bf16[128,128], index: 1, kind: input, shape index: {}]   ;;  %s790_s2 = inlined_call_operand.vmem [shape: bf16[1,128], index: 2, kind: input, shape index: {}]   ;;  %s791_s3 = inlined_call_operand.hbm [shape: bf16[128,128], index: 3, kind: input, shape index: {}]   ;;  %s792_s4 = inlined_call_operand.vmem [shape: bf16[1,128], index: 4, kind: input, shape index: {}]   ;;  %s793_s5 = inlined_call_operand.hbm [shape: bf16[128,128], index: 5, kind: input, shape index: {}]   ;;  %s794_s6 = inlined_call_operand.vmem [shape: f32[1,128], index: 6, kind: input, shape index: {}]   ;;  %s795_s7 = inlined_call_operand.vmem [shape: f32[16,128], index: 7, kind: output, shape index: {}]  }
   0x1   :  { %13 = vsyncpa [#allocation5], 0  ;;  %s637_s24 = smov [#allocation4]   ;;  %s638_s26 = smov [#allocation2]  }
   0x2   :  { %s35_s25 = sshll.u32 %s637_s24, 4  ;;  %s21_s27 = sshll.u32 %s638_s26, 4  ;;  %s36_s25 = int_to_ptr.vmem [resolvable:$true] %s35_s25  ;;  %s685_s27 = int_to_ptr.vmem [resolvable:$true] %s21_s27 }
   0x3   :  { %s567_s30 = scalar_lea.hbm %s791_s3, 1024 }
   0x4   :  { %p568_p0 = scmp.ne.s32.totalorder %s791_s3, %s567_s30  ;;  %p571_p1 = scmp.lt.u32.totalorder %s567_s30, %s791_s3 }
   0x6   :  { %p573_p2 = pnand %p571_p1, %p568_p0 }
   0x8   :  { %576 = shalt.err (!%p573_p2)
}
   0x9   :  { %s577_s12 = scalar_lea.vmem %s36_s25, 1024  ;;  %p582_p4 = scmp.lt.s32.totalorder %s36_s25, %s36_s25 }
   0xa   :  { %p578_p3 = scmp.ne.s32.totalorder %s36_s25, %s577_s12  ;;  %p583_p5 = scmp.lt.s32.totalorder %s577_s12, %s577_s12 }
   0xc   :  { %p584_p6 = por %p583_p5, %p582_p4 }
   0xe   :  { %p585_p7 = pnand %p584_p6, %p578_p3 }
  0x10   :  { %588 = shalt.err (!%p585_p7)
}
  0x11   :  { %s639_s13 = smov 64   ;;  %s640_s14 = smov 4  }
  0x12   :  { %41 = dma.hbm_to_vmem [thread:$0]  %s791_s3, 1024, %s36_s25, [#allocation5], %s639_s13, %s639_s13, %s640_s14  }
  0x13   :  { %s589_s19 = scalar_lea.hbm %s789_s1, 1024 }
  0x14   :  { %p590_p8 = scmp.ne.s32.totalorder %s789_s1, %s589_s19  ;;  %p593_p9 = scmp.lt.u32.totalorder %s589_s19, %s789_s1 }
  0x16   :  { %p595_p10 = pnand %p593_p9, %p590_p8 }
  0x18   :  { %598 = shalt.err (!%p595_p10)
}
  0x19   :  { %s599_s24 = scalar_lea.vmem %s685_s27, 1024  ;;  %p604_p12 = scmp.lt.s32.totalorder %s685_s27, %s685_s27 }
  0x1a   :  { %p600_p11 = scmp.ne.s32.totalorder %s685_s27, %s599_s24  ;;  %p605_p13 = scmp.lt.s32.totalorder %s599_s24, %s599_s24 }
  0x1c   :  { %p606_p0 = por %p605_p13, %p604_p12 }
  0x1e   :  { %p607_p1 = pnand %p606_p0, %p600_p11 }
  0x20   :  { %610 = shalt.err (!%p607_p1)
}
  0x21   :  { %27 = dma.hbm_to_vmem [thread:$0]  %s789_s1, 1024, %s685_s27, [#allocation3], %s639_s13, %s639_s13, %s640_s14  }
  0x22   :  { %s641_s26 = smov [#allocation6]   ;;  %s611_s8 = scalar_lea.hbm %s793_s5, 1024 }
  0x23   :  { %s49_s28 = sshll.u32 %s641_s26, 4  ;;  %p612_p2 = scmp.ne.s32.totalorder %s793_s5, %s611_s8  ;;  %s50_s28 = int_to_ptr.vmem [resolvable:$true] %s49_s28 }
  0x24   :  { %p615_p3 = scmp.lt.u32.totalorder %s611_s8, %s793_s5 }
  0x26   :  { %p617_p4 = pnand %p615_p3, %p612_p2 }
  0x28   :  { %620 = shalt.err (!%p617_p4)
}
  0x29   :  { %s621_s15 = scalar_lea.vmem %s50_s28, 1024  ;;  %p626_p6 = scmp.lt.s32.totalorder %s50_s28, %s50_s28 }
  0x2a   :  { %p622_p5 = scmp.ne.s32.totalorder %s50_s28, %s621_s15  ;;  %p627_p7 = scmp.lt.s32.totalorder %s621_s15, %s621_s15 }
  0x2c   :  { %p628_p8 = por %p627_p7, %p626_p6 }
  0x2e   :  { %p629_p9 = pnand %p628_p8, %p622_p5 }
  0x30   :  { %632 = shalt.err (!%p629_p9)
}
  0x31   :  { %55 = dma.hbm_to_vmem [thread:$0]  %s793_s5, 1024, %s50_s28, [#allocation5], %s639_s13, %s639_s13, %s640_s14  }
  0x32   :  { %633 = dma.done.wait [#allocation3], 1024  }
  0x33   :  { %634 = vsyncadd [#allocation3], 4294966272 }
  0x34   :  { %635 = dma.done.wait [#allocation5], 2048  }
  0x35   :  { %636 = vsyncadd [#allocation5], 4294965248  ;;  %v642_v0 = vmov 0.0   ;;  %vm643_vm0 = vmmov 0   ;;  %v543_v1 = vld [vmem:[#allocation2] sm:$0xff]   ;;  %v544_v2 = vld [vmem:[#allocation2 + $0x8] sm:$0xff]   ;;  %v181_v26 = vlaneseq }
  0x36   :  { %475 = vmatprep.subr.bf16.mxu0 %v642_v0  ;;  %491 = vmatprep.mubr.msk.bf16.mxu0 %vm643_vm0, %v642_v0  ;;  %v545_v3 = vld [vmem:[#allocation2 + $0x10] sm:$0xff]   ;;  %v551_v4 = vld [vmem:[#allocation4] sm:$0xff]   ;;  %v546_v5 = vld [vmem:[#allocation2 + $0x18] sm:$0xff]   ;;  %v644_v38 = vmov 0  }
  0x37   :  { %495 = vmatprep.subr.bf16.mxu1 %v642_v0  ;;  %511 = vmatprep.mubr.msk.bf16.mxu1 %vm643_vm0, %v642_v0  ;;  %v552_v6 = vld [vmem:[#allocation4 + $0x8] sm:$0xff]   ;;  %v547_v7 = vld [vmem:[#allocation2 + $0x20] sm:$0xff]   ;;  %v553_v8 = vld [vmem:[#allocation4 + $0x10] sm:$0xff]   ;;  %v182_v27 = vshrl.u32 %v181_v26, 7 }
  0x38   :  { %476 = vmatpush3.bf16.msra.mxu0 %v543_v1  ;;  %496 = vmatpush3.bf16.msra.mxu1 %v551_v4  ;;  %v548_v9 = vld [vmem:[#allocation2 + $0x28] sm:$0xff]   ;;  %v554_v10 = vld [vmem:[#allocation4 + $0x18] sm:$0xff]   ;;  %v549_v11 = vld [vmem:[#allocation2 + $0x30] sm:$0xff]  }
  0x39   :  { %477 = vmatprep.subr.bf16.mxu0 %v642_v0  ;;  %497 = vmatprep.subr.bf16.mxu1 %v642_v0  ;;  %v555_v12 = vld [vmem:[#allocation4 + $0x20] sm:$0xff]   ;;  %v550_v13 = vld [vmem:[#allocation2 + $0x38] sm:$0xff]   ;;  %v69_v15 = vld [vmem:[%s788_s0 + $0x8] sm:$0xff]  ;;  %v183_v30 = vsub.s32 0, %v182_v27 }
  0x3a   :  { %v68_v14 = vld [vmem:[%s788_s0] sm:$0xff]  ;;  %v556_v16 = vld [vmem:[#allocation4 + $0x28] sm:$0xff]   ;;  %v557_v18 = vld [vmem:[#allocation4 + $0x30] sm:$0xff]  }
  0x3b   :  { %v70_v17 = vpack.c.bf16 %v69_v15, %v68_v14  ;;  %v558_v19 = vld [vmem:[#allocation4 + $0x38] sm:$0xff]   ;;  %v559_v20 = vld [vmem:[#allocation6] sm:$0xff]   ;;  %v560_v21 = vld [vmem:[#allocation6 + $0x8] sm:$0xff]  }
  0x3c   :  { %478 = vmatpush3.bf16.msra.mxu0 %v544_v2  ;;  %498 = vmatpush3.bf16.msra.mxu1 %v552_v6  ;;  %v561_v22 = vld [vmem:[#allocation6 + $0x10] sm:$0xff]   ;;  %v562_v23 = vld [vmem:[#allocation6 + $0x18] sm:$0xff]   ;;  %v563_v24 = vld [vmem:[#allocation6 + $0x20] sm:$0xff]  }
  0x3d   :  { %479 = vmatprep.subr.bf16.mxu0 %v642_v0  ;;  %499 = vmatprep.subr.bf16.mxu1 %v642_v0  ;;  %v564_v25 = vld [vmem:[#allocation6 + $0x28] sm:$0xff]   ;;  %v177_v28 = vld [vmem:[%s790_s2] sm:$0x1]  ;;  %v565_v40 = vld [vmem:[#allocation6 + $0x30] sm:$0xff]  }
  0x3e   :  { %v179_v29 = vpack.i.b16 %v177_v28, %v177_v28  ;;  %v566_v41 = vld [vmem:[#allocation6 + $0x38] sm:$0xff]   ;;  %v293_v42 = vld [vmem:[%s792_s4] sm:$0x1] }
  0x3f   :  { %v295_v43 = vpack.i.b16 %v293_v42, %v293_v42  ;;  %v439_v52 = vld [vmem:[%s794_s6] ss:$0 sm:$0xff] }
  0x40   :  { %480 = vmatpush3.bf16.msra.mxu0 %v545_v3  ;;  %500 = vmatpush3.bf16.msra.mxu1 %v553_v8  ;;  %v184_v33 = vrot.slane %v179_v29, %v183_v30 }
  0x41   :  { %481 = vmatprep.subr.bf16.mxu0 %v642_v0  ;;  %501 = vmatprep.subr.bf16.mxu1 %v642_v0  ;;  %v300_v46 = vrot.slane %v295_v43, %v183_v30 }
  0x44   :  { %482 = vmatpush3.bf16.msra.mxu0 %v546_v5  ;;  %502 = vmatpush3.bf16.msra.mxu1 %v554_v10 }
  0x45   :  { %483 = vmatprep.subr.bf16.mxu0 %v642_v0  ;;  %503 = vmatprep.subr.bf16.mxu1 %v642_v0 }
  0x48   :  { %484 = vmatpush3.bf16.msra.mxu0 %v547_v7  ;;  %504 = vmatpush3.bf16.msra.mxu1 %v555_v12 }
  0x49   :  { %485 = vmatprep.subr.bf16.mxu0 %v642_v0  ;;  %505 = vmatprep.subr.bf16.mxu1 %v642_v0 }
  0x4c   :  { %486 = vmatpush3.bf16.msra.mxu0 %v548_v9  ;;  %506 = vmatpush3.bf16.msra.mxu1 %v556_v16 }
  0x4d   :  { %487 = vmatprep.subr.bf16.mxu0 %v642_v0  ;;  %507 = vmatprep.subr.bf16.mxu1 %v642_v0 }
  0x50   :  { %488 = vmatpush3.bf16.msra.mxu0 %v549_v11  ;;  %508 = vmatpush3.bf16.msra.mxu1 %v557_v18 }
  0x51   :  { %489 = vmatprep.subr.bf16.mxu0 %v642_v0  ;;  %509 = vmatprep.subr.bf16.mxu1 %v642_v0 }
  0x54   :  { %490 = vmatpush3.bf16.msra.mxu0 %v550_v13  ;;  %510 = vmatpush3.bf16.msra.mxu1 %v558_v19 }
  0x55   :  { %515 = vmatprep.subr.bf16.mxu0 %v642_v0 }
  0x57   :  { %492 = vmatmul.mubr.bf16.vlgmr.msra.gmra.mrb[0].mxu0 %v70_v17 }
  0x58   :  { %531 = vmatprep.mubr.msk.bf16.mxu0 %vm643_vm0, %v642_v0  ;;  %516 = vmatpush3.bf16.msra.mxu0 %v559_v20 }
  0x59   :  { %517 = vmatprep.subr.bf16.mxu0 %v642_v0 }
  0x5c   :  { %518 = vmatpush3.bf16.msra.mxu0 %v560_v21 }
  0x5d   :  { %519 = vmatprep.subr.bf16.mxu0 %v642_v0 }
  0x60   :  { %520 = vmatpush3.bf16.msra.mxu0 %v561_v22 }
  0x61   :  { %521 = vmatprep.subr.bf16.mxu0 %v642_v0 }
  0x64   :  { %522 = vmatpush3.bf16.msra.mxu0 %v562_v23 }
  0x65   :  { %523 = vmatprep.subr.bf16.mxu0 %v642_v0 }
  0x68   :  { %524 = vmatpush3.bf16.msra.mxu0 %v563_v24 }
  0x69   :  { %525 = vmatprep.subr.bf16.mxu0 %v642_v0 }
  0x6c   :  { %526 = vmatpush3.bf16.msra.mxu0 %v564_v25 }
  0x6d   :  { %527 = vmatprep.subr.bf16.mxu0 %v642_v0 }
  0x70   :  { %528 = vmatpush3.bf16.msra.mxu0 %v565_v40 }
  0x71   :  { %529 = vmatprep.subr.bf16.mxu0 %v642_v0 }
  0x74   :  { %530 = vmatpush3.bf16.msra.mxu0 %v566_v41 }
 0x12a   :  { %v169_v31 = vpop.f32.mrb[0].mxu0 }
 0x12b   :  { %v493_v32 = vpop.f32.mrb[1].mxu0 }
 0x12c   :  { %v172_v34 = vpop.f32.mrb[2].mxu0 }
 0x12d   :  { %v176_v35 = vpack.c.bf16 %v172_v34, %v169_v31  ;;  %v494_v36 = vpop.f32.mrb[3].mxu0 }
 0x12f   :  { %v185_v37 = vadd.bf16 %v184_v33, %v176_v35 }
 0x131   :  { %v186_v39 = vmax.bf16 %v644_v38, %v185_v37 }
 0x133   :  { %512 = vmatmul.mubr.bf16.vlgmr.msra.gmra.mrb[0].mxu1 %v186_v39 }
 0x206   :  { %v285_v44 = vpop.f32.mrb[0].mxu1 }
 0x207   :  { %v513_v45 = vpop.f32.mrb[1].mxu1 }
 0x208   :  { %v288_v47 = vpop.f32.mrb[2].mxu1 }
 0x209   :  { %v292_v48 = vpack.c.bf16 %v288_v47, %v285_v44  ;;  %v514_v49 = vpop.f32.mrb[3].mxu1 }
 0x20b   :  { %v301_v50 = vadd.bf16 %v300_v46, %v292_v48 }
 0x20d   :  { %v302_v51 = vmax.bf16 %v644_v38, %v301_v50 }
 0x20f   :  { %532 = vmatmul.mubr.bf16.vlgmr.msra.gmra.mrb[4].mxu0 %v302_v51 }
 0x2e2   :  { %v408_v53 = vpop.f32.mrb[4].mxu0 }
 0x2e3   :  { %v409_v54 = vadd.f32 %v439_v52, %v408_v53  ;;  %v533_v55 = vpop.f32.mrb[5].mxu0 }
 0x2e4   :  { %v411_v56 = vpop.f32.mrb[6].mxu0 }
 0x2e5   :  { %415 = vst [vmem:[%s795_s7] sm:$0xff] %v409_v54  ;;  %v412_v57 = vadd.f32 %v439_v52, %v411_v56  ;;  %v534_v58 = vpop.f32.mrb[7].mxu0 }
 0x2e7   :  { %416 = vst [vmem:[%s795_s7 + $0x8] sm:$0xff] %v412_v57 }
 0x2e8   :  { %421 = vsyncpa [#allocation3], 1 }
 0x2e9   :  { %422 = vsyncpa [#allocation5], 1 }

</bundles_post_ra>
